<compile_context>
chip_gen: v7x
topology: tpu7x:2x2x1
jax: 0.10.0
libtpu: 0.0.40
codegen_flags: <defaults>
</compile_context>

<pallas_src>
import functools

import jax
import jax.numpy as jnp
from jax.experimental import pallas as pl
from jax.experimental.pallas import tpu as pltpu

_LANES = 128      # vreg lane width  (last block dim multiple)
_SUBLANES = 8     # vreg sublane width (second-to-last block dim multiple)


def _round_up(a: int, b: int) -> int:
    return ((a + b - 1) // b) * b


def _out_dtype_for(dtype):
    # PyTorch promotes integer/bool tensors to the default float dtype when
    # multiplied by a Python float; floating inputs keep their dtype.
    if jnp.issubdtype(jnp.dtype(dtype), jnp.floating):
        return jnp.dtype(dtype)
    return jnp.dtype(jnp.float32)


def _xla_scale(x, scale, out_dtype):
    # Single fused HBM pass; used for tiny or lane-unaligned inputs.
    return (x.astype(jnp.float32) * jnp.float32(scale)).astype(out_dtype)


def _scale_kernel(x_ref, o_ref, *, scale):
    # Multiply in f32 so the scale constant is not pre-rounded to a
    # low-precision dtype; cast only the result (bf16 sees <= 1 ulp diff vs a
    # dtype-native multiply, and integer inputs promote correctly).
    x = x_ref[...]
    o_ref[...] = (x.astype(jnp.float32) * jnp.float32(scale)).astype(o_ref.dtype)


def _generation_params():
    """(target_tile_bytes, vmem_limit_bytes) tuned per TPU generation."""
    try:
        kind = jax.devices()[0].device_kind.lower()
    except Exception:
        kind = ""
    if "v7" in kind:
        # 64 MiB VMEM per TC: 4 MiB tiles -> ~16 MiB double-buffered in+out.
        return 4 * 1024 * 1024, 48 * 1024 * 1024
    if "v6" in kind:
        # 128 MiB VMEM: 8 MiB tiles -> ~32 MiB live; raise the scoped limit.
        return 8 * 1024 * 1024, 64 * 1024 * 1024
    # v5e / unknown: stay inside the 16 MiB default scoped VMEM (2 MiB tiles
    # already amortize the ~0.35 us/step overhead to <7% at ~0.8 TB/s).
    return 2 * 1024 * 1024, None


def scale_forward(x: jax.Array,
                  scale: float,
                  *,
                  min_kernel_elems: int = 256 * 1024,
                  target_tile_bytes: int | None = None,
                  vmem_limit_bytes: int | None = None,
                  donate: bool = False) -> jax.Array:
    """Elementwise x * scale via a row-tiled, double-buffered Pallas TPU kernel."""
    orig_shape = x.shape
    orig_dtype = x.dtype
    out_dtype = _out_dtype_for(orig_dtype)
    n = x.size

    # Tiny inputs, empty inputs, or lane-unaligned element counts: a single
    # fused XLA multiply is already at (or above) what the kernel path could
    # deliver once dispatch / pad / slice overheads are counted.
    if n == 0 or n < min_kernel_elems or n % _LANES != 0:
        return _xla_scale(x, scale, out_dtype)

    if target_tile_bytes is None or vmem_limit_bytes is None:
        auto_tile, auto_vmem = _generation_params()
        target_tile_bytes = target_tile_bytes or auto_tile
        vmem_limit_bytes = vmem_limit_bytes or auto_vmem

    # Lane-dense 2-D layout: last dim a multiple of 128 that divides n exactly
    # (no padding, no tail, no extra HBM passes).
    cols = 512
    while n % cols != 0:
        cols //= 2              # 512 -> 256 -> 128; terminates since n % 128 == 0
    rows = n // cols
    x2d = x.reshape(rows, cols)

    in_isz = jnp.dtype(orig_dtype).itemsize
    out_isz = jnp.dtype(out_dtype).itemsize
    itemsize = max(in_isz, out_isz)

    # Rows per block: multiple of 8, sized to ~target_tile_bytes, and small
    # enough to leave >= 2 grid steps (v7x dual-TC sharding + pipeline overlap).
    tr = max(_SUBLANES,
             (target_tile_bytes // (cols * itemsize)) // _SUBLANES * _SUBLANES)
    if rows >= 2 * _SUBLANES:
        tr = min(tr, max(_SUBLANES, _round_up(pl.cdiv(rows, 2), _SUBLANES)))
    tr = min(tr, _round_up(rows, _SUBLANES))
    if tr > rows:
        tr = rows               # single exact block (equals full dim -> legal)

    grid = (pl.cdiv(rows, tr),)

    extra_kwargs = {}
    if donate and jnp.dtype(orig_dtype) == jnp.dtype(out_dtype):
        # Only valid (and only a win) when shapes/dtypes match and the caller
        # actually donates the input buffer.
        extra_kwargs["input_output_aliases"] = {0: 0}

    out2d = pl.pallas_call(
        functools.partial(_scale_kernel, scale=float(scale)),
        out_shape=jax.ShapeDtypeStruct((rows, cols), out_dtype),
        grid_spec=pl.GridSpec(
            grid=grid,
            in_specs=[pl.BlockSpec((tr, cols), lambda i: (i, 0))],
            out_specs=pl.BlockSpec((tr, cols), lambda i: (i, 0)),
        ),
        compiler_params=pltpu.CompilerParams(
            dimension_semantics=("parallel",),      # lets v7x shard blocks over 2 TCs
            vmem_limit_bytes=vmem_limit_bytes,
        ),
        cost_estimate=pl.CostEstimate(
            flops=n,
            transcendentals=0,
            bytes_accessed=n * in_isz + n * out_isz,
        ),
        **extra_kwargs,
    )(x2d)

    return out2d.reshape(orig_shape)


if __name__ == "__main__":
    scale = 1.0 / 255.0  # ppo_vt2 uses Scale(1/255) on image observations

    # 1) Small NCHW float32 input, forced through the kernel path.
    x = jax.random.normal(jax.random.PRNGKey(0), (2, 4, 16, 16), dtype=jnp.float32)
    y = jax.block_until_ready(scale_forward(x, scale, min_kernel_elems=0))
    assert y.shape == x.shape and y.dtype == x.dtype
    assert jnp.allclose(y, x * jnp.float32(scale), atol=1e-6, rtol=1e-6)

    # 2) Slightly larger input -> multi-block grid (exercises the pipeline).
    x2 = jax.random.normal(jax.random.PRNGKey(1), (4, 4, 32, 32), dtype=jnp.float32)
    y2 = jax.block_until_ready(scale_forward(x2, scale, min_kernel_elems=0))
    assert jnp.allclose(y2, x2 * jnp.float32(scale), atol=1e-6, rtol=1e-6)

    # 3) uint8 image observations (the actual ppo_vt2 use case): promotes to f32.
    x3 = jax.random.randint(jax.random.PRNGKey(2), (8, 4, 32, 32), 0, 256,
                            dtype=jnp.int32).astype(jnp.uint8)
    y3 = jax.block_until_ready(scale_forward(x3, scale, min_kernel_elems=0))
    assert y3.shape == x3.shape and y3.dtype == jnp.float32
    assert jnp.allclose(y3, x3.astype(jnp.float32) * jnp.float32(scale),
                        atol=1e-6, rtol=1e-6)

    # 4) Lane-unaligned element count -> single-pass XLA fallback (no pad/slice).
    x4 = jax.random.normal(jax.random.PRNGKey(3), (4, 8, 33, 33), dtype=jnp.float32)
    y4 = jax.block_until_ready(scale_forward(x4, scale))
    assert y4.shape == x4.shape and y4.dtype == x4.dtype
    assert jnp.allclose(y4, x4 * jnp.float32(scale), atol=1e-6, rtol=1e-6)

    print("KERNEL_OK")
</pallas_src>

<mosaic_0001>
module attributes {stable_mosaic.version = 11 : i64} {
  func.func @_scale_kernel(%arg0: i32, %arg1: memref<4x512xf32, #tpu.memory_space<vmem>>, %arg2: memref<4x512xf32, #tpu.memory_space<vmem>>) attributes {dimension_semantics = [#tpu.dimension_semantics<parallel>], iteration_bounds = array<i64: 1>, scalar_prefetch = 0 : i64, scratch_operands = 0 : i64, tpu.core_type = #tpu.core_type<tc>, window_params = [{transform_indices = @transform_0, window_bounds = array<i64: 4, 512>}, {transform_indices = @transform_1, window_bounds = array<i64: 4, 512>}]} {
    %c0 = arith.constant 0 : index
    %c0_0 = arith.constant 0 : index
    %0 = vector.load %arg1[%c0, %c0_0] : memref<4x512xf32, #tpu.memory_space<vmem>>, vector<4x512xf32>
    %cst = arith.constant 0.00392156886 : f32
    %1 = vector.broadcast %cst : f32 to vector<4x512xf32>
    %2 = arith.mulf %0, %1 : vector<4x512xf32>
    %c0_1 = arith.constant 0 : index
    %c0_2 = arith.constant 0 : index
    %3 = vector.load %arg2[%c0_1, %c0_2] : memref<4x512xf32, #tpu.memory_space<vmem>>, vector<4x512xf32>
    tpu.vector_store %arg2[%c0_1, %c0_2], %2 {strides = array<i32>} : memref<4x512xf32, #tpu.memory_space<vmem>>, vector<4x512xf32>,
    return
  }
  func.func @transform_0(%arg0: i32) -> (i32, i32) {
    %c0_i32 = arith.constant 0 : i32
    %c0_i32_0 = arith.constant 0 : i32
    return %arg0, %c0_i32 : i32, i32
  }
  func.func @transform_1(%arg0: i32) -> (i32, i32) {
    %c0_i32 = arith.constant 0 : i32
    %c0_i32_0 = arith.constant 0 : i32
    return %arg0, %c0_i32 : i32, i32
  }
}

</mosaic_0001>

<bundles_post_ra>
// kernel: tpu_custom_call.1
= control target key start
LH: loop header
LB: loop body
LE: loop exit
PB: predicated region body
PF: predicated region fallthrough
CT: control target
= control target key end

     0   :  { %6 = vsyncpa [#allocation3], 0  ;;  %s128_s0 = inlined_call_operand.hbm [shape: f32[4,512], index: 0, kind: input, shape index: {}]   ;;  %s129_s1 = inlined_call_operand.hbm [shape: f32[4,512], index: 1, kind: output, shape index: {}]  }
   0x1   :  { %7 = vsyncpa [#allocation4], 0  ;;  %s92_s6 = smov [#allocation2]   ;;  %s44_s10 = scalar_lea.hbm %s128_s0, 256 }
   0x2   :  { %s14_s7 = sshll.u32 %s92_s6, 4  ;;  %p45_p0 = scmp.ne.s32.totalorder %s128_s0, %s44_s10  ;;  %s15_s7 = int_to_ptr.vmem [resolvable:$true] %s14_s7 }
   0x3   :  { %p48_p1 = scmp.lt.u32.totalorder %s44_s10, %s128_s0 }
   0x5   :  { %p50_p2 = pnand %p48_p1, %p45_p0 }
   0x7   :  { %53 = shalt.err (!%p50_p2)
}
   0x8   :  { %s54_s15 = scalar_lea.vmem %s15_s7, 256  ;;  %p59_p4 = scmp.lt.s32.totalorder %s15_s7, %s15_s7 }
   0x9   :  { %p55_p3 = scmp.ne.s32.totalorder %s15_s7, %s54_s15  ;;  %p60_p5 = scmp.lt.s32.totalorder %s54_s15, %s54_s15 }
   0xb   :  { %p61_p6 = por %p60_p5, %p59_p4 }
   0xd   :  { %p62_p7 = pnand %p61_p6, %p55_p3 }
   0xf   :  { %65 = shalt.err (!%p62_p7)
}
  0x10   :  { %17 = dma.hbm_to_vmem [thread:$0]  %s128_s0, 256, %s15_s7, [#allocation3]  }
  0x11   :  { %88 = dma.done.wait [#allocation3], 256  }
  0x12   :  { %89 = vsyncadd [#allocation3], 4294967040  ;;  %s93_s18 = smov [#allocation5]   ;;  %v21_v0 = vld [vmem:[#allocation2] sm:$0xff]  ;;  %v22_v1 = vld [vmem:[#allocation2 + $0x8] sm:$0xff] }
  0x13   :  { %s33_s19 = sshll.u32 %s93_s18, 4  ;;  %v23_v2 = vmul.f32 0.003921569, %v21_v0  ;;  %v24_v3 = vmul.f32 0.003921569, %v22_v1  ;;  %s34_s19 = int_to_ptr.vmem [resolvable:$true] %s33_s19 }
  0x14   :  { %s66_s20 = scalar_lea.vmem %s34_s19, 256  ;;  %p71_p9 = scmp.lt.s32.totalorder %s34_s19, %s34_s19 }
  0x15   :  { %25 = vst [vmem:[#allocation5] sm:$0xff] %v23_v2  ;;  %26 = vst [vmem:[#allocation5 + $0x8] sm:$0xff] %v24_v3  ;;  %p67_p8 = scmp.ne.s32.totalorder %s34_s19, %s66_s20  ;;  %p72_p10 = scmp.lt.s32.totalorder %s66_s20, %s66_s20 }
  0x17   :  { %p73_p11 = por %p72_p10, %p71_p9 }
  0x19   :  { %p74_p12 = pnand %p73_p11, %p67_p8 }
  0x1b   :  { %77 = shalt.err (!%p74_p12)
}
  0x1c   :  { %s78_s22 = scalar_lea.hbm %s129_s1, 256 }
  0x1d   :  { %p79_p13 = scmp.ne.s32.totalorder %s129_s1, %s78_s22  ;;  %p82_p0 = scmp.lt.u32.totalorder %s78_s22, %s129_s1 }
  0x1f   :  { %p84_p1 = pnand %p82_p0, %p79_p13 }
  0x21   :  { %87 = shalt.err (!%p84_p1)
}
  0x22   :  { %36 = dma.vmem_to_hbm [thread:$0]  %s34_s19, 256, %s129_s1, [#allocation4]  }
  0x23   :  { %90 = dma.done.wait [#allocation4], 256  }
  0x24   :  { %91 = vsyncadd [#allocation4], 4294967040 }
  0x25   :  { %40 = vsyncpa [#allocation3], 1 }
  0x26   :  { %41 = vsyncpa [#allocation4], 1 }

</bundles_post_ra>
